<compile_context>
chip_gen: v7x
topology: tpu7x:2x2x1
jax: 0.10.0
libtpu: 0.0.40
codegen_flags: <defaults>
</compile_context>

<pallas_src>
import jax
import jax.numpy as jnp
from jax.experimental import pallas as pl
from jax.experimental.pallas import tpu as pltpu


def reward_kernel(q_ids_ref, a_ids_ref,   # VMEM: (TB, Lq), (TB, La) int32
                  sq_ref, sa_ref,         # VMEM: (1, V) f32 per-token score LUTs
                  bias_ref,               # SMEM: (1,) f32
                  out_ref):               # VMEM out block: (1, TB) f32
    TB, Lq = q_ids_ref.shape
    _, La = a_ids_ref.shape
    V = sq_ref.shape[-1]

    # Vocab ids along the 128-lane axis.
    vocab = jax.lax.broadcasted_iota(jnp.int32, (1, 1, V), dimension=2)

    def lut_mean(ids, lut, seq_len):
        # ids: (TB, L) int32, lut: (1, V) f32  ->  (TB,) f32
        onehot = ids[:, :, None] == vocab                       # (TB, L, V) bool
        vals = jnp.where(onehot, lut[None, :, :], 0.0)          # (TB, L, V) f32
        per_tok = jnp.sum(vals, axis=-1)                        # (TB, L) lane reduce
        return jnp.sum(per_tok, axis=-1) * (1.0 / seq_len)      # (TB,)

    scores = (lut_mean(q_ids_ref[...], sq_ref[...], Lq)
              + lut_mean(a_ids_ref[...], sa_ref[...], La)
              + bias_ref[0])
    out_ref[0, :] = scores                                       # lane-dense (1, TB)


def simple_reward_model(q_ids, a_ids, embed_table, weight, bias, *, batch_block=None):
    """Pallas forward pass of SimpleRewardModel.

    q_ids: (B, Lq) int, a_ids: (B, La) int, embed_table: (V, D),
    weight: (1, 2*D) nn.Linear layout, bias: (1,).  Returns (B,) f32 scores.
    """
    B, Lq = q_ids.shape
    B2, La = a_ids.shape
    assert B == B2
    V, D = embed_table.shape

    # ---- parameter-only preprocessing (exact algebraic fold) -----------------
    # score[b] = mean_l w_q.E[q_ids[b,l]] + mean_l w_a.E[a_ids[b,l]] + bias,
    # so fold embedding table + classifier weight into two (V,) score LUTs.
    w = weight.astype(jnp.float32)
    et = embed_table.astype(jnp.float32)
    s_q = (et @ w[0, :D]).reshape(1, V)                 # (1, V)
    s_a = (et @ w[0, D:]).reshape(1, V)                 # (1, V)
    bias_f32 = bias.reshape((1,)).astype(jnp.float32)   # (1,)

    # ---- batch tiling ---------------------------------------------------------
    if batch_block is not None:
        TB = batch_block
    elif B >= 16 and B % 16 == 0:
        TB = min(B // 2, 128)   # >=2 grid blocks so v7x's two TensorCores both get work
    else:
        TB = B
    assert B % TB == 0, "batch must be divisible by the batch block"

    grid_spec = pltpu.PrefetchScalarGridSpec(
        num_scalar_prefetch=0,
        grid=(B // TB,),
        in_specs=[
            pl.BlockSpec((TB, Lq), lambda i: (i, 0)),            # q ids tile
            pl.BlockSpec((TB, La), lambda i: (i, 0)),            # a ids tile
            pl.BlockSpec((1, V), lambda i: (0, 0)),              # s_q LUT (resident)
            pl.BlockSpec((1, V), lambda i: (0, 0)),              # s_a LUT (resident)
            pl.BlockSpec(memory_space=pltpu.MemorySpace.SMEM),   # bias scalar
        ],
        out_specs=pl.BlockSpec((1, TB), lambda i: (0, i)),       # lane-dense scores
    )

    out = pl.pallas_call(
        reward_kernel,
        out_shape=jax.ShapeDtypeStruct((1, B), jnp.float32),
        grid_spec=grid_spec,
        compiler_params=pltpu.CompilerParams(
            dimension_semantics=("parallel",)),                  # batch blocks across TCs
    )(q_ids.astype(jnp.int32), a_ids.astype(jnp.int32), s_q, s_a, bias_f32)
    return out[0]                                                # (B,)


if __name__ == "__main__":
    # Small shapes consistent with the module (embed_dim default = 16).
    B = 2          # batch
    Lq = 8         # question length
    La = 8         # answer length
    V = 32         # vocab_size
    D = 16         # embed_dim

    key = jax.random.PRNGKey(0)
    k_q, k_a, k_e, k_w, k_b = jax.random.split(key, 5)

    q_ids = jax.random.randint(k_q, (B, Lq), 0, V, dtype=jnp.int32)
    a_ids = jax.random.randint(k_a, (B, La), 0, V, dtype=jnp.int32)

    # Deterministic synthetic parameters (nn.Embedding / nn.Linear shapes).
    embed_table = jax.random.normal(k_e, (V, D), dtype=jnp.float32) * 0.1
    weight = jax.random.normal(k_w, (1, 2 * D), dtype=jnp.float32) * 0.1   # nn.Linear.weight
    bias = jax.random.normal(k_b, (1,), dtype=jnp.float32) * 0.1           # nn.Linear.bias

    scores = simple_reward_model(q_ids, a_ids, embed_table, weight, bias)
    jax.block_until_ready(scores)

    # Pure-JAX reference (matches the PyTorch forward).
    q_emb_ref = embed_table[q_ids].mean(axis=1)
    a_emb_ref = embed_table[a_ids].mean(axis=1)
    x_ref = jnp.concatenate([q_emb_ref, a_emb_ref], axis=-1)
    ref = (x_ref @ weight.T + bias)[:, 0]

    assert scores.shape == (B,)
    assert jnp.allclose(scores, ref, atol=1e-5, rtol=1e-5), (scores, ref)

    print("KERNEL_OK")
</pallas_src>

<mosaic_0001>
module attributes {stable_mosaic.version = 11 : i64} {
  func.func @reward_kernel(%arg0: i32, %arg1: memref<2x8xi32, #tpu.memory_space<vmem>>, %arg2: memref<2x8xi32, #tpu.memory_space<vmem>>, %arg3: memref<1x32xf32, #tpu.memory_space<vmem>>, %arg4: memref<1x32xf32, #tpu.memory_space<vmem>>, %arg5: memref<1xf32, #tpu.memory_space<smem>>, %arg6: memref<1x2xf32, #tpu.memory_space<vmem>>) attributes {dimension_semantics = [#tpu.dimension_semantics<parallel>], iteration_bounds = array<i64: 1>, scalar_prefetch = 0 : i64, scratch_operands = 0 : i64, tpu.core_type = #tpu.core_type<tc>, window_params = [{transform_indices = @transform_0, window_bounds = array<i64: 2, 8>}, {transform_indices = @transform_1, window_bounds = array<i64: 2, 8>}, {pipeline_mode = #tpu.pipeline_mode<synchronous>, transform_indices = @transform_2, window_bounds = array<i64: 1, 32>}, {pipeline_mode = #tpu.pipeline_mode<synchronous>, transform_indices = @transform_3, window_bounds = array<i64: 1, 32>}, {transform_indices = @transform_4, window_bounds = array<i64: 1>}, {transform_indices = @transform_5, window_bounds = array<i64: 1, 2>}]} {
    %0 = tpu.iota {dimensions = array<i32: 2>} : vector<1x1x32xi32>
    %c0 = arith.constant 0 : index
    %c0_0 = arith.constant 0 : index
    %1 = vector.load %arg1[%c0, %c0_0] : memref<2x8xi32, #tpu.memory_space<vmem>>, vector<2x8xi32>
    %c0_1 = arith.constant 0 : index
    %c0_2 = arith.constant 0 : index
    %2 = vector.load %arg3[%c0_1, %c0_2] : memref<1x32xf32, #tpu.memory_space<vmem>>, vector<1x32xf32>
    %3 = vector.shape_cast %1 : vector<2x8xi32> to vector<2x8x1xi32>
    %4 = vector.broadcast %3 : vector<2x8x1xi32> to vector<2x8x32xi32>
    %5 = vector.broadcast %0 : vector<1x1x32xi32> to vector<2x8x32xi32>
    %6 = arith.cmpi eq, %4, %5 : vector<2x8x32xi32>
    %7 = vector.shape_cast %2 : vector<1x32xf32> to vector<1x1x32xf32>
    %cst = arith.constant 0.000000e+00 : f32
    %8 = vector.shape_cast %7 : vector<1x1x32xf32> to vector<1x1x32xf32>
    %9 = vector.broadcast %8 : vector<1x1x32xf32> to vector<2x8x32xf32>
    %10 = vector.broadcast %cst : f32 to vector<2x8x32xf32>
    %11 = arith.select %6, %9, %10 : vector<2x8x32xi1>, vector<2x8x32xf32>
    %cst_3 = arith.constant dense<0.000000e+00> : vector<2x8xf32>
    %12 = vector.multi_reduction <add>, %11, %cst_3 [2] : vector<2x8x32xf32> to vector<2x8xf32>
    %cst_4 = arith.constant dense<0.000000e+00> : vector<2xf32>
    %13 = vector.multi_reduction <add>, %12, %cst_4 [1] : vector<2x8xf32> to vector<2xf32>
    %cst_5 = arith.constant 1.250000e-01 : f32
    %14 = vector.broadcast %cst_5 : f32 to vector<2xf32>
    %15 = arith.mulf %13, %14 : vector<2xf32>
    %c0_6 = arith.constant 0 : index
    %c0_7 = arith.constant 0 : index
    %16 = vector.load %arg2[%c0_6, %c0_7] : memref<2x8xi32, #tpu.memory_space<vmem>>, vector<2x8xi32>
    %c0_8 = arith.constant 0 : index
    %c0_9 = arith.constant 0 : index
    %17 = vector.load %arg4[%c0_8, %c0_9] : memref<1x32xf32, #tpu.memory_space<vmem>>, vector<1x32xf32>
    %18 = vector.shape_cast %16 : vector<2x8xi32> to vector<2x8x1xi32>
    %19 = vector.broadcast %18 : vector<2x8x1xi32> to vector<2x8x32xi32>
    %20 = vector.broadcast %0 : vector<1x1x32xi32> to vector<2x8x32xi32>
    %21 = arith.cmpi eq, %19, %20 : vector<2x8x32xi32>
    %22 = vector.shape_cast %17 : vector<1x32xf32> to vector<1x1x32xf32>
    %cst_10 = arith.constant 0.000000e+00 : f32
    %23 = vector.shape_cast %22 : vector<1x1x32xf32> to vector<1x1x32xf32>
    %24 = vector.broadcast %23 : vector<1x1x32xf32> to vector<2x8x32xf32>
    %25 = vector.broadcast %cst_10 : f32 to vector<2x8x32xf32>
    %26 = arith.select %21, %24, %25 : vector<2x8x32xi1>, vector<2x8x32xf32>
    %cst_11 = arith.constant dense<0.000000e+00> : vector<2x8xf32>
    %27 = vector.multi_reduction <add>, %26, %cst_11 [2] : vector<2x8x32xf32> to vector<2x8xf32>
    %cst_12 = arith.constant dense<0.000000e+00> : vector<2xf32>
    %28 = vector.multi_reduction <add>, %27, %cst_12 [1] : vector<2x8xf32> to vector<2xf32>
    %cst_13 = arith.constant 1.250000e-01 : f32
    %29 = vector.broadcast %cst_13 : f32 to vector<2xf32>
    %30 = arith.mulf %28, %29 : vector<2xf32>
    %31 = arith.addf %15, %30 : vector<2xf32>
    %c0_14 = arith.constant 0 : index
    %32 = memref.load %arg5[%c0_14] : memref<1xf32, #tpu.memory_space<smem>>
    %33 = vector.broadcast %32 : f32 to vector<2xf32>
    %34 = arith.addf %31, %33 : vector<2xf32>
    %c0_15 = arith.constant 0 : index
    %c0_16 = arith.constant 0 : index
    %35 = vector.load %arg6[%c0_15, %c0_16] : memref<1x2xf32, #tpu.memory_space<vmem>>, vector<1x2xf32>
    %36 = vector.shape_cast %35 : vector<1x2xf32> to vector<2xf32>
    %37 = vector.shape_cast %34 : vector<2xf32> to vector<1x2xf32>
    tpu.vector_store %arg6[%c0_15, %c0_16], %37 {strides = array<i32>} : memref<1x2xf32, #tpu.memory_space<vmem>>, vector<1x2xf32>,
    return
  }
  func.func @transform_0(%arg0: i32) -> (i32, i32) {
    %c0_i32 = arith.constant 0 : i32
    %c0_i32_0 = arith.constant 0 : i32
    return %arg0, %c0_i32 : i32, i32
  }
  func.func @transform_1(%arg0: i32) -> (i32, i32) {
    %c0_i32 = arith.constant 0 : i32
    %c0_i32_0 = arith.constant 0 : i32
    return %arg0, %c0_i32 : i32, i32
  }
  func.func @transform_2(%arg0: i32) -> (i32, i32) {
    %c0_i32 = arith.constant 0 : i32
    %c0_i32_0 = arith.constant 0 : i32
    %c0_i32_1 = arith.constant 0 : i32
    return %c0_i32, %c0_i32_0 : i32, i32
  }
  func.func @transform_3(%arg0: i32) -> (i32, i32) {
    %c0_i32 = arith.constant 0 : i32
    %c0_i32_0 = arith.constant 0 : i32
    %c0_i32_1 = arith.constant 0 : i32
    return %c0_i32, %c0_i32_0 : i32, i32
  }
  func.func @transform_4(%arg0: i32) -> i32 {
    %c0_i32 = arith.constant 0 : i32
    %c0_i32_0 = arith.constant 0 : i32
    return %c0_i32 : i32
  }
  func.func @transform_5(%arg0: i32) -> (i32, i32) {
    %c0_i32 = arith.constant 0 : i32
    %c0_i32_0 = arith.constant 0 : i32
    return %c0_i32, %arg0 : i32, i32
  }
}

</mosaic_0001>

<bundles_post_ra>
// kernel: tpu_custom_call.1
= control target key start
LH: loop header
LB: loop body
LE: loop exit
PB: predicated region body
PF: predicated region fallthrough
CT: control target
= control target key end

     0   :  { %v22_v0 = vlaneseq  ;;  %s238_s0 = inlined_call_operand.vmem [shape: s32[2,8], index: 0, kind: input, shape index: {}]   ;;  %s239_s1 = inlined_call_operand.vmem [shape: s32[2,8], index: 1, kind: input, shape index: {}]   ;;  %s240_s2 = inlined_call_operand.vmem [shape: f32[1,32], index: 2, kind: input, shape index: {}]   ;;  %s241_s3 = inlined_call_operand.vmem [shape: f32[1,32], index: 3, kind: input, shape index: {}]   ;;  %s242_s4 = inlined_call_operand.<no memory space> [shape: f32[1], index: 4, kind: input, shape index: {}]   ;;  %s243_s5 = inlined_call_operand.hbm [shape: f32[1,2], index: 5, kind: output, shape index: {}]  }
   0x1   :  { %11 = vsyncpa [#allocation4], 0  ;;  %v24_v2 = vld [vmem:[%s238_s0] sm:$0x3]  ;;  %vm50_vm0 = vcmask 261120   ;;  %vm67_vm5 = vcmask 1041409   ;;  %v125_v42 = vstv %s242_s4 }
   0x2   :  { %v27_v1 = vshrl.u32 %v22_v0, 7  ;;  %v75_v3 = vld [vmem:[%s239_s1] sm:$0x3]  ;;  %v23_v10 = vand.u32 127, %v22_v0  ;;  %vm70_vm6 = vcmask 58368   ;;  %vm133_vm7 = vcmask 8192  }
   0x3   :  { %v149_v11 = vld [vmem:[%s240_s2] ss:$0 sm:$0xff] }
   0x4   :  { %v28_v4 = vsub.s32 0, %v27_v1  ;;  %v35_v5 = vsub.s32 1, %v27_v1  ;;  %v150_v12 = vld [vmem:[%s241_s3] ss:$0 sm:$0xff]  ;;  %v61_v26 = vsub.s32 %v23_v10, %v27_v1  ;;  %s176_s3 = smov [#allocation3]  }
   0x5   :  { %s141_s25 = sshll.u32 %s176_s3, 4  ;;  %s142_s25 = int_to_ptr.vmem [resolvable:$true] %s141_s25 }
   0x6   :  { %v29_v6 = vrot.slane %v24_v2, %v28_v4  ;;  %v80_v7 = vrot.slane %v75_v3, %v28_v4  ;;  %v36_v8 = vrot.slane %v24_v2, %v35_v5  ;;  %v87_v9 = vrot.slane %v75_v3, %v35_v5  ;;  %s152_s26 = scalar_lea.vmem %s142_s25, 16  ;;  %s156_s27 = scalar_lea.vmem %s142_s25, 32 }
   0x7   :  { %p153_p0 = scmp.ne.s32.totalorder %s142_s25, %s152_s26  ;;  %p157_p1 = scmp.lt.s32.totalorder %s142_s25, %s142_s25 }
   0x8   :  { %31 = vbcast.lane.b32.xlu0 %v29_v6, 256  ;;  %82 = vbcast.lane.b32.xlu1 %v80_v7, 256  ;;  %p158_p2 = scmp.lt.s32.totalorder %s156_s27, %s152_s26 }
   0xa   :  { %p159_p3 = por %p158_p2, %p157_p1 }
   0xc   :  { %38 = vbcast.lane.b32.xlu0 %v36_v8, 256  ;;  %89 = vbcast.lane.b32.xlu1 %v87_v9, 256  ;;  %p160_p4 = pnand %p159_p3, %p153_p0 }
  0x7a   :  { %v32_v13 = vpop.permute.xlu0 %31  ;;  %v83_v14 = vpop.permute.xlu1 %82 }
  0x7b   :  { %vm40_vm1 = vcmp.eq.s32.totalorder %v32_v13, %v23_v10  ;;  %vm91_vm2 = vcmp.eq.s32.totalorder %v83_v14, %v23_v10 }
  0x7c   :  { %v48_v15 = vsel %vm40_vm1, %v149_v11, 0.0  ;;  %v99_v16 = vsel %vm91_vm2, %v150_v12, 0.0 }
  0x7d   :  { %v51_v17 = vsel %vm50_vm0, %v48_v15, 0.0  ;;  %v101_v20 = vsel %vm50_vm0, %v99_v16, 0.0 }
  0x7e   :  { %v39_v18 = vpop.permute.xlu0 %38  ;;  %52 = vadd.xlane.f32.xlu0 %v51_v17  ;;  %v90_v19 = vpop.permute.xlu1 %89 }
  0x7f   :  { %vm41_vm3 = vcmp.eq.s32.totalorder %v39_v18, %v23_v10  ;;  %vm92_vm4 = vcmp.eq.s32.totalorder %v90_v19, %v23_v10 }
  0x80   :  { %v49_v21 = vsel %vm41_vm3, %v149_v11, 0.0  ;;  %v100_v22 = vsel %vm92_vm4, %v150_v12, 0.0 }
  0x81   :  { %v54_v23 = vsel %vm50_vm0, %v49_v21, 0.0  ;;  %v104_v24 = vsel %vm50_vm0, %v100_v22, 0.0 }
  0x82   :  { %55 = vadd.xlane.f32.xlu1 %v54_v23  ;;  %102 = vadd.xlane.f32.xlu0 %v101_v20 }
  0x86   :  { %105 = vadd.xlane.f32.xlu0 %v104_v24 }
 0x10b   :  { %v53_v25 = vpop.xlane.xlu0 %52 }
 0x10c   :  { %v62_v29 = vrot.slane %v53_v25, %v61_v26 }
 0x10f   :  { %v56_v27 = vpop.xlane.xlu1 %55  ;;  %v103_v28 = vpop.xlane.xlu0 %102 }
 0x110   :  { %v66_v30 = vrot.slane %v56_v27, %v61_v26  ;;  %v112_v34 = vrot.slane %v103_v28, %v61_v26 }
 0x112   :  { %v68_v31 = vsel %vm67_vm5, %v66_v30, %v62_v29 }
 0x113   :  { %v106_v32 = vpop.xlane.xlu0 %105  ;;  %v71_v33 = vsel %vm70_vm6, %v68_v31, 0.0 }
 0x114   :  { %v116_v35 = vrot.slane %v106_v32, %v61_v26  ;;  %72 = vadd.xlane.f32.xlu1 %v71_v33 }
 0x116   :  { %v117_v36 = vsel %vm67_vm5, %v116_v35, %v112_v34 }
 0x117   :  { %v119_v37 = vsel %vm70_vm6, %v117_v36, 0.0 }
 0x118   :  { %120 = vadd.xlane.f32.xlu0 %v119_v37 }
 0x1a1   :  { %v73_v38 = vpop.xlane.xlu1 %72 }
 0x1a2   :  { %v74_v40 = vmul.f32 0.125, %v73_v38 }
 0x1a5   :  { %v121_v39 = vpop.xlane.xlu0 %120 }
 0x1a6   :  { %v122_v41 = vmul.f32 0.125, %v121_v39 }
 0x1a8   :  { %v123_v43 = vadd.f32 %v122_v41, %v74_v40 }
 0x1aa   :  { %v126_v44 = vadd.f32 %v125_v42, %v123_v43 }
 0x1ac   :  { %v131_v45 = vrot.slane %v126_v44, %v61_v26 }
 0x1ae   :  { %134 = vst.msk [vmem:[#allocation3] sm:$0x1] %vm133_vm7, %v131_v45 }
 0x1af   :  { %163 = shalt.err (!%p160_p4)
}
 0x1b0   :  { %s164_s4 = scalar_lea.hbm %s243_s5, 16 }
 0x1b1   :  { %p165_p5 = scmp.ne.s32.totalorder %s243_s5, %s164_s4  ;;  %p168_p6 = scmp.lt.u32.totalorder %s164_s4, %s243_s5 }
 0x1b3   :  { %p170_p7 = pnand %p168_p6, %p165_p5 }
 0x1b5   :  { %173 = shalt.err (!%p170_p7)
}
 0x1b6   :  { %144 = dma.vmem_to_hbm [thread:$0]  %s142_s25, 16, %s243_s5, [#allocation4]  }
 0x1b7   :  { %174 = dma.done.wait [#allocation4], 16  }
 0x1b8   :  { %175 = vsyncadd [#allocation4], 4294967280 }
 0x1b9   :  { %148 = vsyncpa [#allocation4], 1 }

</bundles_post_ra>
